<compile_context>
chip_gen: v6e
topology: v6e:2x2x1
jax: 0.10.0
libtpu: 0.0.40
codegen_flags: <defaults>
</compile_context>

<pallas_src>
import functools

import jax
import jax.numpy as jnp
import numpy as np
from jax.experimental import pallas as pl
from jax.experimental.pallas import tpu as pltpu

TINY = 1e-6


def _ntf_kernel(mf_ref, bp_ref, x_ref, sp_ref, sf_ref, o_ref, *, num_segments):
    _, b_pad, n_pad = x_ref.shape
    shape = (b_pad, n_pad)

    # scalars pre-combined in the wrapper: [T, kappa, T/(tau+eps), nu*T/tau, delta*T]
    T = mf_ref[0]
    kappa = mf_ref[1]
    c_relax = mf_ref[2]
    c_nu = mf_ref[3]
    c_delta = mf_ref[4]

    # Per-segment coefficient rows, combined on the (1, n_pad) strip and
    # sublane-broadcast once to full (8,128) tiles.
    delta_row = sf_ref[0:1, :]          # Delta
    lam_row = sf_ref[1:2, :]            # lambda
    inv_delta_row = 1.0 / delta_row
    inv_dl_row = inv_delta_row / lam_row
    lam = jnp.broadcast_to(lam_row, shape)
    cT_delta = jnp.broadcast_to(T * inv_delta_row, shape)        # T/Delta
    cnu_delta = jnp.broadcast_to(c_nu * inv_delta_row, shape)    # nu*T/(tau*Delta)
    cdelta_dl = jnp.broadcast_to(c_delta * inv_dl_row, shape)    # delta*T/(Delta*lam)
    cT_dl = jnp.broadcast_to(T * inv_dl_row, shape)              # T/(Delta*lam)

    # segment params — each a full (8,128) tile
    vf = sp_ref[0]
    a_var = sp_ref[1]
    rhocr = sp_ref[2]
    g = sp_ref[3]
    omegar = sp_ref[4]
    omegas = sp_ref[5]
    epsq = sp_ref[6]
    epsv = sp_ref[7]

    # input mask (g applied to the rho channel) + relu; channel 2 (v) is unused
    # because the module runs with calculate_velocity=True.
    q = jnp.maximum(x_ref[0], 0.0)
    rho = jnp.maximum(x_ref[1] * g, 0.0)
    r = jnp.maximum(x_ref[3], 0.0)
    s = jnp.maximum(x_ref[4], 0.0)

    # boundary values per batch row, (b_pad, 1), lane-broadcast at use sites
    v0 = bp_ref[0]
    q0 = bp_ref[1]
    rho_np1 = bp_ref[2]

    # current velocities (calculate_velocity=True branch)
    vel = jnp.clip(q / (rho * lam + TINY), 5.0, 200.0)

    # boundary lane masks, built once and reused
    lane = jax.lax.broadcasted_iota(jnp.int32, shape, 1)
    is_first = lane == 0
    is_last = lane == num_segments - 1

    # prev/next neighbours along the segment (lane) axis.  pltpu.roll requires
    # non-negative shifts: shift=n_pad-1 is the circular equivalent of -1.
    # Wrapped/padded lanes are overwritten by the boundary values.
    prev_vel = jnp.where(is_first, v0, pltpu.roll(vel, shift=1, axis=1))
    prev_q = jnp.where(is_first, q0, pltpu.roll(q, shift=1, axis=1))
    next_rho = jnp.where(is_last, rho_np1, pltpu.roll(rho, shift=n_pad - 1, axis=1))

    # shared denominator reciprocal (exact — see header note on tolerance)
    inv_rk = 1.0 / (rho + kappa)

    # stationary speed: vf * exp(-1/(a+eps) * (rho/(rhocr+eps) + eps)^a); base > 0
    base = rho / (rhocr + TINY) + TINY
    pow_term = jnp.exp(a_var * jnp.log(base))
    stat_speed = vf * jnp.exp((-1.0 / (a_var + TINY)) * pow_term)

    fut_v = (vel
             + c_relax * (stat_speed - vel)
             + cT_delta * vel * (prev_vel - vel)
             - cnu_delta * (next_rho - rho) * inv_rk
             - cdelta_dl * (r * vel) * inv_rk
             + epsv)

    fut_rho = rho + cT_dl * (prev_q - q + r - s)

    # torch clamps future_densities only after occupancy/flow are computed, and the
    # clamped density itself never reaches the output stack.
    fut_occ = fut_rho / (g + 1e-6)
    fut_q = fut_rho * fut_v * lam + epsq
    fut_r = omegar + r
    fut_s = omegas + s

    # output channel order matches torch.stack((flows, occ, vel, r, s), dim=2);
    # each write is a full, unmasked (8,128) tile store.
    o_ref[0] = jnp.clip(fut_q, 1.0, 10000.0)
    o_ref[1] = jnp.clip(fut_occ, 1.0, 30.0)
    o_ref[2] = jnp.clip(fut_v, 5.0, 120.0)
    o_ref[3] = jnp.clip(fut_r, 0.0, 1000.0)
    o_ref[4] = jnp.clip(fut_s, 0.0, 1000.0)


def ntf_forward(x, segment_params, boundry_params, segment_fixed, model_fixed):
    """x: (B,N,5), segment_params: (B,N,8), boundry_params: (B,3),
    segment_fixed: (N,2), model_fixed: (1,5).  Returns (B, N*5)."""
    B, N, _ = x.shape
    b_pad = ((B + 7) // 8) * 8
    n_pad = ((N + 127) // 128) * 128

    # channel-major, batch on sublanes, segments on lanes
    x_p = jnp.pad(jnp.transpose(x, (2, 0, 1)).astype(jnp.float32),
                  ((0, 0), (0, b_pad - B), (0, n_pad - N)))
    sp_p = jnp.pad(jnp.transpose(segment_params, (2, 0, 1)).astype(jnp.float32),
                   ((0, 0), (0, b_pad - B), (0, n_pad - N)))
    bp_p = jnp.pad(jnp.transpose(boundry_params, (1, 0)).astype(jnp.float32),
                   ((0, 0), (0, b_pad - B)))[:, :, None]            # (3, b_pad, 1)
    # pad Delta/lambda with 1.0 so padded lanes never divide by zero
    sf_p = jnp.pad(jnp.transpose(segment_fixed, (1, 0)).astype(jnp.float32),
                   ((0, 0), (0, n_pad - N)), constant_values=1.0)    # (2, n_pad)

    # fold the purely-scalar coefficients once, outside the kernel
    T = model_fixed[0, 0]
    tau = model_fixed[0, 1]
    nu = model_fixed[0, 2]
    delta = model_fixed[0, 3]
    kappa = model_fixed[0, 4]
    mf_p = jnp.stack([T, kappa, T / (tau + TINY),
                      nu * T / tau, delta * T]).astype(jnp.float32)  # (5,)

    kernel = functools.partial(_ntf_kernel, num_segments=N)

    out = pl.pallas_call(
        kernel,
        out_shape=jax.ShapeDtypeStruct((5, b_pad, n_pad), jnp.float32),
        in_specs=[
            pl.BlockSpec(memory_space=pltpu.MemorySpace.SMEM),   # coefficients (5,)
            pl.BlockSpec(memory_space=pltpu.MemorySpace.VMEM),   # boundary (3,b_pad,1)
            pl.BlockSpec(memory_space=pltpu.MemorySpace.VMEM),   # x (5,b_pad,n_pad)
            pl.BlockSpec(memory_space=pltpu.MemorySpace.VMEM),   # segment_params (8,..)
            pl.BlockSpec(memory_space=pltpu.MemorySpace.VMEM),   # segment_fixed (2,n_pad)
        ],
        out_specs=pl.BlockSpec(memory_space=pltpu.MemorySpace.VMEM),
    )(mf_p, bp_p, x_p, sp_p, sf_p)

    # drop padding, channel-last per segment, flatten -> (B, 5N)
    out = jnp.transpose(out[:, :B, :N], (1, 2, 0))
    return out.reshape(B, N * 5)


def ntf_reference(x, sp, bp, sf, mf):
    """Pure-JAX reference mirroring the PyTorch forward (for validation)."""
    T, tau, nu, delta, kappa = (mf[0, i] for i in range(5))
    Delta = sf[:, 0]
    lam = sf[:, 1]
    g = sp[:, :, 3]
    mask = jnp.ones_like(x).at[:, :, 1].set(g)
    x = jax.nn.relu(x * mask)
    q, rho, r, s = x[:, :, 0], x[:, :, 1], x[:, :, 3], x[:, :, 4]
    v0, q0, rhoNp1 = bp[:, 0:1], bp[:, 1:2], bp[:, 2:3]
    vf, a, rhocr = sp[:, :, 0], sp[:, :, 1], sp[:, :, 2]
    omegar, omegas, epsq, epsv = (sp[:, :, 4], sp[:, :, 5], sp[:, :, 6],
                                  sp[:, :, 7])
    vel = jnp.clip(q / (rho * lam + TINY), 5.0, 200.0)
    prev_vel = jnp.concatenate([v0, vel[:, :-1]], axis=1)
    next_rho = jnp.concatenate([rho[:, 1:], rhoNp1], axis=1)
    stat = vf * jnp.exp((-1.0 / (a + TINY)) *
                        jnp.power(rho / (rhocr + TINY) + TINY, a))
    fut_v = (vel + (T / (tau + TINY)) * (stat - vel)
             + (T / Delta) * vel * (prev_vel - vel)
             - (nu * T / (tau * Delta)) * (next_rho - rho) / (rho + kappa)
             - (delta * T / (Delta * lam)) * (r * vel) / (rho + kappa)
             + epsv)
    prev_q = jnp.concatenate([q0, q[:, :-1]], axis=1)
    fut_rho = rho + (T / (Delta * lam)) * (prev_q - q + r - s)
    fut_occ = fut_rho / (g + 1e-6)
    fut_q = fut_rho * fut_v * lam + epsq
    fut_r = omegar + r
    fut_s = omegas + s
    fut_v = jnp.clip(fut_v, 5.0, 120.0)
    fut_occ = jnp.clip(fut_occ, 1.0, 30.0)
    fut_q = jnp.clip(fut_q, 1.0, 10000.0)
    fut_r = jnp.clip(fut_r, 0.0, 1000.0)
    fut_s = jnp.clip(fut_s, 0.0, 1000.0)
    out = jnp.stack([fut_q, fut_occ, fut_v, fut_r, fut_s], axis=2)
    return out.reshape(x.shape[0], -1)


if __name__ == "__main__":
    B, N = 4, 18
    key = jax.random.PRNGKey(0)
    ks = jax.random.split(key, 7)

    q = jax.random.uniform(ks[0], (B, N), minval=100.0, maxval=2000.0)
    rho = jax.random.uniform(ks[1], (B, N), minval=10.0, maxval=60.0)
    v = jax.random.uniform(ks[2], (B, N), minval=50.0, maxval=120.0)
    r = jax.random.uniform(ks[3], (B, N), minval=0.0, maxval=100.0)
    s = jax.random.uniform(ks[4], (B, N), minval=0.0, maxval=100.0)
    x = jnp.stack([q, rho, v, r, s], axis=2).astype(jnp.float32)

    lo = jnp.array([90.0, 1.0, 25.0, 1.0, 0.0, 0.0, -5.0, -2.0])
    hi = jnp.array([130.0, 2.5, 45.0, 3.0, 10.0, 10.0, 5.0, 2.0])
    segment_params = (lo + jax.random.uniform(ks[5], (B, N, 8)) * (hi - lo)
                      ).astype(jnp.float32)

    blo = jnp.array([60.0, 200.0, 10.0])
    bhi = jnp.array([110.0, 1500.0, 50.0])
    boundry_params = (blo + jax.random.uniform(ks[6], (B, 3)) * (bhi - blo)
                      ).astype(jnp.float32)

    # deterministic module "parameters" (shapes from __init__)
    seg_idx = jnp.arange(N, dtype=jnp.float32)
    segment_fixed = jnp.stack(
        [0.5 + 0.01 * seg_idx, 2.0 + (seg_idx % 3.0)], axis=1)   # (N,2): Delta, lambda
    model_fixed = jnp.array([[10.0 / 3600.0, 18.0 / 3600.0, 35.0, 1.4, 13.0]],
                            dtype=jnp.float32)                    # T, tau, nu, delta, kappa

    out = jax.jit(ntf_forward)(x, segment_params, boundry_params,
                               segment_fixed, model_fixed)
    out = jax.block_until_ready(out)

    ref = ntf_reference(x, segment_params, boundry_params, segment_fixed,
                        model_fixed)
    np.testing.assert_allclose(np.asarray(out), np.asarray(ref),
                               rtol=1e-3, atol=1e-2)
    print("KERNEL_OK")
</pallas_src>

<mosaic_0001>
module attributes {stable_mosaic.version = 11 : i64} {
  func.func @_ntf_kernel(%arg0: memref<5xf32, #tpu.memory_space<smem>>, %arg1: memref<3x8x1xf32, #tpu.memory_space<vmem>>, %arg2: memref<5x8x128xf32, #tpu.memory_space<vmem>>, %arg3: memref<8x8x128xf32, #tpu.memory_space<vmem>>, %arg4: memref<2x128xf32, #tpu.memory_space<vmem>>, %arg5: memref<5x8x128xf32, #tpu.memory_space<vmem>>) attributes {dimension_semantics = [], scalar_prefetch = 0 : i64, scratch_operands = 0 : i64, tpu.core_type = #tpu.core_type<tc>} {
    %c0 = arith.constant 0 : index
    %0 = memref.load %arg0[%c0] : memref<5xf32, #tpu.memory_space<smem>>
    %c1 = arith.constant 1 : index
    %1 = memref.load %arg0[%c1] : memref<5xf32, #tpu.memory_space<smem>>
    %c2 = arith.constant 2 : index
    %2 = memref.load %arg0[%c2] : memref<5xf32, #tpu.memory_space<smem>>
    %c3 = arith.constant 3 : index
    %3 = memref.load %arg0[%c3] : memref<5xf32, #tpu.memory_space<smem>>
    %c4 = arith.constant 4 : index
    %4 = memref.load %arg0[%c4] : memref<5xf32, #tpu.memory_space<smem>>
    %c0_0 = arith.constant 0 : index
    %c0_1 = arith.constant 0 : index
    %5 = vector.load %arg4[%c0_0, %c0_1] : memref<2x128xf32, #tpu.memory_space<vmem>>, vector<1x128xf32>
    %c1_2 = arith.constant 1 : index
    %c0_3 = arith.constant 0 : index
    %6 = vector.load %arg4[%c1_2, %c0_3] : memref<2x128xf32, #tpu.memory_space<vmem>>, vector<1x128xf32>
    %cst = arith.constant 1.000000e+00 : f32
    %7 = vector.broadcast %cst : f32 to vector<1x128xf32>
    %8 = arith.divf %7, %5 : vector<1x128xf32>
    %9 = arith.divf %8, %6 : vector<1x128xf32>
    %10 = vector.shape_cast %6 : vector<1x128xf32> to vector<1x128xf32>
    %11 = vector.broadcast %10 : vector<1x128xf32> to vector<8x128xf32>
    %12 = vector.broadcast %0 : f32 to vector<1x128xf32>
    %13 = arith.mulf %12, %8 : vector<1x128xf32>
    %14 = vector.shape_cast %13 : vector<1x128xf32> to vector<1x128xf32>
    %15 = vector.broadcast %14 : vector<1x128xf32> to vector<8x128xf32>
    %16 = vector.broadcast %3 : f32 to vector<1x128xf32>
    %17 = arith.mulf %16, %8 : vector<1x128xf32>
    %18 = vector.shape_cast %17 : vector<1x128xf32> to vector<1x128xf32>
    %19 = vector.broadcast %18 : vector<1x128xf32> to vector<8x128xf32>
    %20 = vector.broadcast %4 : f32 to vector<1x128xf32>
    %21 = arith.mulf %20, %9 : vector<1x128xf32>
    %22 = vector.shape_cast %21 : vector<1x128xf32> to vector<1x128xf32>
    %23 = vector.broadcast %22 : vector<1x128xf32> to vector<8x128xf32>
    %24 = vector.broadcast %0 : f32 to vector<1x128xf32>
    %25 = arith.mulf %24, %9 : vector<1x128xf32>
    %26 = vector.shape_cast %25 : vector<1x128xf32> to vector<1x128xf32>
    %27 = vector.broadcast %26 : vector<1x128xf32> to vector<8x128xf32>
    %c0_4 = arith.constant 0 : index
    %c0_5 = arith.constant 0 : index
    %c0_6 = arith.constant 0 : index
    %28 = vector.load %arg3[%c0_4, %c0_5, %c0_6] : memref<8x8x128xf32, #tpu.memory_space<vmem>>, vector<1x8x128xf32>
    %29 = vector.shape_cast %28 : vector<1x8x128xf32> to vector<8x128xf32>
    %c1_7 = arith.constant 1 : index
    %c0_8 = arith.constant 0 : index
    %c0_9 = arith.constant 0 : index
    %30 = vector.load %arg3[%c1_7, %c0_8, %c0_9] : memref<8x8x128xf32, #tpu.memory_space<vmem>>, vector<1x8x128xf32>
    %31 = vector.shape_cast %30 : vector<1x8x128xf32> to vector<8x128xf32>
    %c2_10 = arith.constant 2 : index
    %c0_11 = arith.constant 0 : index
    %c0_12 = arith.constant 0 : index
    %32 = vector.load %arg3[%c2_10, %c0_11, %c0_12] : memref<8x8x128xf32, #tpu.memory_space<vmem>>, vector<1x8x128xf32>
    %33 = vector.shape_cast %32 : vector<1x8x128xf32> to vector<8x128xf32>
    %c3_13 = arith.constant 3 : index
    %c0_14 = arith.constant 0 : index
    %c0_15 = arith.constant 0 : index
    %34 = vector.load %arg3[%c3_13, %c0_14, %c0_15] : memref<8x8x128xf32, #tpu.memory_space<vmem>>, vector<1x8x128xf32>
    %35 = vector.shape_cast %34 : vector<1x8x128xf32> to vector<8x128xf32>
    %c4_16 = arith.constant 4 : index
    %c0_17 = arith.constant 0 : index
    %c0_18 = arith.constant 0 : index
    %36 = vector.load %arg3[%c4_16, %c0_17, %c0_18] : memref<8x8x128xf32, #tpu.memory_space<vmem>>, vector<1x8x128xf32>
    %37 = vector.shape_cast %36 : vector<1x8x128xf32> to vector<8x128xf32>
    %c5 = arith.constant 5 : index
    %c0_19 = arith.constant 0 : index
    %c0_20 = arith.constant 0 : index
    %38 = vector.load %arg3[%c5, %c0_19, %c0_20] : memref<8x8x128xf32, #tpu.memory_space<vmem>>, vector<1x8x128xf32>
    %39 = vector.shape_cast %38 : vector<1x8x128xf32> to vector<8x128xf32>
    %c6 = arith.constant 6 : index
    %c0_21 = arith.constant 0 : index
    %c0_22 = arith.constant 0 : index
    %40 = vector.load %arg3[%c6, %c0_21, %c0_22] : memref<8x8x128xf32, #tpu.memory_space<vmem>>, vector<1x8x128xf32>
    %41 = vector.shape_cast %40 : vector<1x8x128xf32> to vector<8x128xf32>
    %c7 = arith.constant 7 : index
    %c0_23 = arith.constant 0 : index
    %c0_24 = arith.constant 0 : index
    %42 = vector.load %arg3[%c7, %c0_23, %c0_24] : memref<8x8x128xf32, #tpu.memory_space<vmem>>, vector<1x8x128xf32>
    %43 = vector.shape_cast %42 : vector<1x8x128xf32> to vector<8x128xf32>
    %c0_25 = arith.constant 0 : index
    %c0_26 = arith.constant 0 : index
    %c0_27 = arith.constant 0 : index
    %44 = vector.load %arg2[%c0_25, %c0_26, %c0_27] : memref<5x8x128xf32, #tpu.memory_space<vmem>>, vector<1x8x128xf32>
    %45 = vector.shape_cast %44 : vector<1x8x128xf32> to vector<8x128xf32>
    %cst_28 = arith.constant 0.000000e+00 : f32
    %46 = vector.broadcast %cst_28 : f32 to vector<8x128xf32>
    %47 = arith.maximumf %45, %46 : vector<8x128xf32>
    %c1_29 = arith.constant 1 : index
    %c0_30 = arith.constant 0 : index
    %c0_31 = arith.constant 0 : index
    %48 = vector.load %arg2[%c1_29, %c0_30, %c0_31] : memref<5x8x128xf32, #tpu.memory_space<vmem>>, vector<1x8x128xf32>
    %49 = vector.shape_cast %48 : vector<1x8x128xf32> to vector<8x128xf32>
    %50 = arith.mulf %49, %35 : vector<8x128xf32>
    %cst_32 = arith.constant 0.000000e+00 : f32
    %51 = vector.broadcast %cst_32 : f32 to vector<8x128xf32>
    %52 = arith.maximumf %50, %51 : vector<8x128xf32>
    %c3_33 = arith.constant 3 : index
    %c0_34 = arith.constant 0 : index
    %c0_35 = arith.constant 0 : index
    %53 = vector.load %arg2[%c3_33, %c0_34, %c0_35] : memref<5x8x128xf32, #tpu.memory_space<vmem>>, vector<1x8x128xf32>
    %54 = vector.shape_cast %53 : vector<1x8x128xf32> to vector<8x128xf32>
    %cst_36 = arith.constant 0.000000e+00 : f32
    %55 = vector.broadcast %cst_36 : f32 to vector<8x128xf32>
    %56 = arith.maximumf %54, %55 : vector<8x128xf32>
    %c4_37 = arith.constant 4 : index
    %c0_38 = arith.constant 0 : index
    %c0_39 = arith.constant 0 : index
    %57 = vector.load %arg2[%c4_37, %c0_38, %c0_39] : memref<5x8x128xf32, #tpu.memory_space<vmem>>, vector<1x8x128xf32>
    %58 = vector.shape_cast %57 : vector<1x8x128xf32> to vector<8x128xf32>
    %cst_40 = arith.constant 0.000000e+00 : f32
    %59 = vector.broadcast %cst_40 : f32 to vector<8x128xf32>
    %60 = arith.maximumf %58, %59 : vector<8x128xf32>
    %c0_41 = arith.constant 0 : index
    %c0_42 = arith.constant 0 : index
    %c0_43 = arith.constant 0 : index
    %61 = vector.load %arg1[%c0_41, %c0_42, %c0_43] : memref<3x8x1xf32, #tpu.memory_space<vmem>>, vector<1x8x1xf32>
    %62 = vector.shape_cast %61 : vector<1x8x1xf32> to vector<8x1xf32>
    %c1_44 = arith.constant 1 : index
    %c0_45 = arith.constant 0 : index
    %c0_46 = arith.constant 0 : index
    %63 = vector.load %arg1[%c1_44, %c0_45, %c0_46] : memref<3x8x1xf32, #tpu.memory_space<vmem>>, vector<1x8x1xf32>
    %64 = vector.shape_cast %63 : vector<1x8x1xf32> to vector<8x1xf32>
    %c2_47 = arith.constant 2 : index
    %c0_48 = arith.constant 0 : index
    %c0_49 = arith.constant 0 : index
    %65 = vector.load %arg1[%c2_47, %c0_48, %c0_49] : memref<3x8x1xf32, #tpu.memory_space<vmem>>, vector<1x8x1xf32>
    %66 = vector.shape_cast %65 : vector<1x8x1xf32> to vector<8x1xf32>
    %67 = arith.mulf %52, %11 : vector<8x128xf32>
    %cst_50 = arith.constant 9.99999997E-7 : f32
    %68 = vector.broadcast %cst_50 : f32 to vector<8x128xf32>
    %69 = arith.addf %67, %68 : vector<8x128xf32>
    %70 = arith.divf %47, %69 : vector<8x128xf32>
    %cst_51 = arith.constant 5.000000e+00 : f32
    %cst_52 = arith.constant 2.000000e+02 : f32
    %71 = vector.broadcast %cst_51 : f32 to vector<8x128xf32>
    %72 = arith.maximumf %71, %70 : vector<8x128xf32>
    %73 = vector.broadcast %cst_52 : f32 to vector<8x128xf32>
    %74 = arith.minimumf %73, %72 : vector<8x128xf32>
    %75 = tpu.iota {dimensions = array<i32: 1>} : vector<8x128xi32>
    %c0_i32 = arith.constant 0 : i32
    %76 = vector.broadcast %c0_i32 : i32 to vector<8x128xi32>
    %77 = arith.cmpi eq, %75, %76 : vector<8x128xi32>
    %c17_i32 = arith.constant 17 : i32
    %78 = vector.broadcast %c17_i32 : i32 to vector<8x128xi32>
    %79 = arith.cmpi eq, %75, %78 : vector<8x128xi32>
    %c1_i32 = arith.constant 1 : i32
    %80 = tpu.dynamic_rotate %74 by %c1_i32 dim 1 : vector<8x128xf32>, i32 -> vector<8x128xf32>
    %81 = vector.shape_cast %62 : vector<8x1xf32> to vector<8x1xf32>
    %82 = vector.broadcast %81 : vector<8x1xf32> to vector<8x128xf32>
    %83 = arith.select %77, %82, %80 : vector<8x128xi1>, vector<8x128xf32>
    %c1_i32_53 = arith.constant 1 : i32
    %84 = tpu.dynamic_rotate %47 by %c1_i32_53 dim 1 : vector<8x128xf32>, i32 -> vector<8x128xf32>
    %85 = vector.shape_cast %64 : vector<8x1xf32> to vector<8x1xf32>
    %86 = vector.broadcast %85 : vector<8x1xf32> to vector<8x128xf32>
    %87 = arith.select %77, %86, %84 : vector<8x128xi1>, vector<8x128xf32>
    %c127_i32 = arith.constant 127 : i32
    %88 = tpu.dynamic_rotate %52 by %c127_i32 dim 1 : vector<8x128xf32>, i32 -> vector<8x128xf32>
    %89 = vector.shape_cast %66 : vector<8x1xf32> to vector<8x1xf32>
    %90 = vector.broadcast %89 : vector<8x1xf32> to vector<8x128xf32>
    %91 = arith.select %79, %90, %88 : vector<8x128xi1>, vector<8x128xf32>
    %92 = vector.broadcast %1 : f32 to vector<8x128xf32>
    %93 = arith.addf %52, %92 : vector<8x128xf32>
    %cst_54 = arith.constant 1.000000e+00 : f32
    %94 = vector.broadcast %cst_54 : f32 to vector<8x128xf32>
    %95 = arith.divf %94, %93 : vector<8x128xf32>
    %cst_55 = arith.constant 9.99999997E-7 : f32
    %96 = vector.broadcast %cst_55 : f32 to vector<8x128xf32>
    %97 = arith.addf %33, %96 : vector<8x128xf32>
    %98 = arith.divf %52, %97 : vector<8x128xf32>
    %cst_56 = arith.constant 9.99999997E-7 : f32
    %99 = vector.broadcast %cst_56 : f32 to vector<8x128xf32>
    %100 = arith.addf %98, %99 : vector<8x128xf32>
    %101 = math.log %100 : vector<8x128xf32>
    %102 = arith.mulf %31, %101 : vector<8x128xf32>
    %103 = math.exp %102 : vector<8x128xf32>
    %cst_57 = arith.constant 9.99999997E-7 : f32
    %104 = vector.broadcast %cst_57 : f32 to vector<8x128xf32>
    %105 = arith.addf %31, %104 : vector<8x128xf32>
    %cst_58 = arith.constant -1.000000e+00 : f32
    %106 = vector.broadcast %cst_58 : f32 to vector<8x128xf32>
    %107 = arith.divf %106, %105 : vector<8x128xf32>
    %108 = arith.mulf %107, %103 : vector<8x128xf32>
    %109 = math.exp %108 : vector<8x128xf32>
    %110 = arith.mulf %29, %109 : vector<8x128xf32>
    %111 = arith.subf %110, %74 : vector<8x128xf32>
    %112 = vector.broadcast %2 : f32 to vector<8x128xf32>
    %113 = arith.mulf %112, %111 : vector<8x128xf32>
    %114 = arith.addf %74, %113 : vector<8x128xf32>
    %115 = arith.mulf %15, %74 : vector<8x128xf32>
    %116 = arith.subf %83, %74 : vector<8x128xf32>
    %117 = arith.mulf %115, %116 : vector<8x128xf32>
    %118 = arith.addf %114, %117 : vector<8x128xf32>
    %119 = arith.subf %91, %52 : vector<8x128xf32>
    %120 = arith.mulf %19, %119 : vector<8x128xf32>
    %121 = arith.mulf %120, %95 : vector<8x128xf32>
    %122 = arith.subf %118, %121 : vector<8x128xf32>
    %123 = arith.mulf %56, %74 : vector<8x128xf32>
    %124 = arith.mulf %23, %123 : vector<8x128xf32>
    %125 = arith.mulf %124, %95 : vector<8x128xf32>
    %126 = arith.subf %122, %125 : vector<8x128xf32>
    %127 = arith.addf %126, %43 : vector<8x128xf32>
    %128 = arith.subf %87, %47 : vector<8x128xf32>
    %129 = arith.addf %128, %56 : vector<8x128xf32>
    %130 = arith.subf %129, %60 : vector<8x128xf32>
    %131 = arith.mulf %27, %130 : vector<8x128xf32>
    %132 = arith.addf %52, %131 : vector<8x128xf32>
    %cst_59 = arith.constant 9.99999997E-7 : f32
    %133 = vector.broadcast %cst_59 : f32 to vector<8x128xf32>
    %134 = arith.addf %35, %133 : vector<8x128xf32>
    %135 = arith.divf %132, %134 : vector<8x128xf32>
    %136 = arith.mulf %132, %127 : vector<8x128xf32>
    %137 = arith.mulf %136, %11 : vector<8x128xf32>
    %138 = arith.addf %137, %41 : vector<8x128xf32>
    %139 = arith.addf %37, %56 : vector<8x128xf32>
    %140 = arith.addf %39, %60 : vector<8x128xf32>
    %cst_60 = arith.constant 1.000000e+00 : f32
    %cst_61 = arith.constant 1.000000e+04 : f32
    %141 = vector.broadcast %cst_60 : f32 to vector<8x128xf32>
    %142 = arith.maximumf %141, %138 : vector<8x128xf32>
    %143 = vector.broadcast %cst_61 : f32 to vector<8x128xf32>
    %144 = arith.minimumf %143, %142 : vector<8x128xf32>
    %c0_62 = arith.constant 0 : index
    %c0_63 = arith.constant 0 : index
    %c0_64 = arith.constant 0 : index
    %145 = vector.load %arg5[%c0_62, %c0_63, %c0_64] : memref<5x8x128xf32, #tpu.memory_space<vmem>>, vector<1x8x128xf32>
    %146 = vector.shape_cast %145 : vector<1x8x128xf32> to vector<8x128xf32>
    %147 = vector.shape_cast %144 : vector<8x128xf32> to vector<1x8x128xf32>
    tpu.vector_store %arg5[%c0_62, %c0_63, %c0_64], %147 {strides = array<i32>} : memref<5x8x128xf32, #tpu.memory_space<vmem>>, vector<1x8x128xf32>,
    %cst_65 = arith.constant 1.000000e+00 : f32
    %cst_66 = arith.constant 3.000000e+01 : f32
    %148 = vector.broadcast %cst_65 : f32 to vector<8x128xf32>
    %149 = arith.maximumf %148, %135 : vector<8x128xf32>
    %150 = vector.broadcast %cst_66 : f32 to vector<8x128xf32>
    %151 = arith.minimumf %150, %149 : vector<8x128xf32>
    %c1_67 = arith.constant 1 : index
    %c0_68 = arith.constant 0 : index
    %c0_69 = arith.constant 0 : index
    %152 = vector.load %arg5[%c1_67, %c0_68, %c0_69] : memref<5x8x128xf32, #tpu.memory_space<vmem>>, vector<1x8x128xf32>
    %153 = vector.shape_cast %152 : vector<1x8x128xf32> to vector<8x128xf32>
    %154 = vector.shape_cast %151 : vector<8x128xf32> to vector<1x8x128xf32>
    tpu.vector_store %arg5[%c1_67, %c0_68, %c0_69], %154 {strides = array<i32>} : memref<5x8x128xf32, #tpu.memory_space<vmem>>, vector<1x8x128xf32>,
    %cst_70 = arith.constant 5.000000e+00 : f32
    %cst_71 = arith.constant 1.200000e+02 : f32
    %155 = vector.broadcast %cst_70 : f32 to vector<8x128xf32>
    %156 = arith.maximumf %155, %127 : vector<8x128xf32>
    %157 = vector.broadcast %cst_71 : f32 to vector<8x128xf32>
    %158 = arith.minimumf %157, %156 : vector<8x128xf32>
    %c2_72 = arith.constant 2 : index
    %c0_73 = arith.constant 0 : index
    %c0_74 = arith.constant 0 : index
    %159 = vector.load %arg5[%c2_72, %c0_73, %c0_74] : memref<5x8x128xf32, #tpu.memory_space<vmem>>, vector<1x8x128xf32>
    %160 = vector.shape_cast %159 : vector<1x8x128xf32> to vector<8x128xf32>
    %161 = vector.shape_cast %158 : vector<8x128xf32> to vector<1x8x128xf32>
    tpu.vector_store %arg5[%c2_72, %c0_73, %c0_74], %161 {strides = array<i32>} : memref<5x8x128xf32, #tpu.memory_space<vmem>>, vector<1x8x128xf32>,
    %cst_75 = arith.constant 0.000000e+00 : f32
    %cst_76 = arith.constant 1.000000e+03 : f32
    %162 = vector.broadcast %cst_75 : f32 to vector<8x128xf32>
    %163 = arith.maximumf %162, %139 : vector<8x128xf32>
    %164 = vector.broadcast %cst_76 : f32 to vector<8x128xf32>
    %165 = arith.minimumf %164, %163 : vector<8x128xf32>
    %c3_77 = arith.constant 3 : index
    %c0_78 = arith.constant 0 : index
    %c0_79 = arith.constant 0 : index
    %166 = vector.load %arg5[%c3_77, %c0_78, %c0_79] : memref<5x8x128xf32, #tpu.memory_space<vmem>>, vector<1x8x128xf32>
    %167 = vector.shape_cast %166 : vector<1x8x128xf32> to vector<8x128xf32>
    %168 = vector.shape_cast %165 : vector<8x128xf32> to vector<1x8x128xf32>
    tpu.vector_store %arg5[%c3_77, %c0_78, %c0_79], %168 {strides = array<i32>} : memref<5x8x128xf32, #tpu.memory_space<vmem>>, vector<1x8x128xf32>,
    %cst_80 = arith.constant 0.000000e+00 : f32
    %cst_81 = arith.constant 1.000000e+03 : f32
    %169 = vector.broadcast %cst_80 : f32 to vector<8x128xf32>
    %170 = arith.maximumf %169, %140 : vector<8x128xf32>
    %171 = vector.broadcast %cst_81 : f32 to vector<8x128xf32>
    %172 = arith.minimumf %171, %170 : vector<8x128xf32>
    %c4_82 = arith.constant 4 : index
    %c0_83 = arith.constant 0 : index
    %c0_84 = arith.constant 0 : index
    %173 = vector.load %arg5[%c4_82, %c0_83, %c0_84] : memref<5x8x128xf32, #tpu.memory_space<vmem>>, vector<1x8x128xf32>
    %174 = vector.shape_cast %173 : vector<1x8x128xf32> to vector<8x128xf32>
    %175 = vector.shape_cast %172 : vector<8x128xf32> to vector<1x8x128xf32>
    tpu.vector_store %arg5[%c4_82, %c0_83, %c0_84], %175 {strides = array<i32>} : memref<5x8x128xf32, #tpu.memory_space<vmem>>, vector<1x8x128xf32>,
    return
  }
}

</mosaic_0001>

<bundles_post_ra>
// kernel: ntf_forward.1
= control target key start
LH: loop header
LB: loop body
LE: loop exit
PB: predicated region body
PF: predicated region fallthrough
CT: control target
= control target key end

     0   :  { %10 = vsyncpa [#allocation3], 0  ;;  %s448_s0 = inlined_call_operand.vmem [shape: f32[5], index: 0, kind: input, shape index: {}]   ;;  %s449_s1 = inlined_call_operand.vmem [shape: f32[3,8,1], index: 1, kind: input, shape index: {}]   ;;  %s450_s2 = inlined_call_operand.vmem [shape: f32[5,8,128], index: 2, kind: input, shape index: {}]   ;;  %s451_s3 = inlined_call_operand.vmem [shape: f32[8,8,128], index: 3, kind: input, shape index: {}]   ;;  %s452_s4 = inlined_call_operand.vmem [shape: f32[2,128], index: 4, kind: input, shape index: {}]   ;;  %s453_s5 = inlined_call_operand.vmem [shape: f32[5,8,128], index: 5, kind: output, shape index: {}]  }
   0x1   :  { %s17_s20 = sshll.u32 %s448_s0, 4  ;;  %s18_s20 = int_to_ptr.vmem [resolvable:$true] %s17_s20 }
   0x2   :  { %s257_s21 = scalar_lea.vmem %s18_s20, 16  ;;  %p262_p1 = scmp.lt.s32.totalorder %s18_s20, %s18_s20 }
   0x3   :  { %p258_p0 = scmp.ne.s32.totalorder %s18_s20, %s257_s21  ;;  %p263_p2 = scmp.lt.s32.totalorder %s257_s21, %s257_s21 }
   0x5   :  { %p264_p3 = por %p263_p2, %p262_p1 }
   0x7   :  { %p265_p4 = pnand %p264_p3, %p258_p0 }
   0x9   :  { %268 = shalt.err (!%p265_p4)
}
   0xa   :  { %s271_s22 = smov [#allocation2]  }
   0xb   :  { %20 = dma.vmem_to_smem %s18_s20, 16, %s271_s22, [#allocation3]  }
   0xc   :  { %269 = dma.done.wait [#allocation3], 16  }
   0xd   :  { %270 = vsyncadd [#allocation3], 4294967280 }
   0xe   :  { %32 = sfence }
   0xf   :  { %v98_v0 = vld [vmem:[%s449_s1] sm:$0xff]  ;;  %v225_v1 = vld [vmem:[%s449_s1 + $0x8] sm:$0xff]  ;;  %v44_v2 = vlaneseq  ;;  %v272_v3 = vmov 0   ;;  %v317_v4 = vld [vmem:[%s451_s3 + $0x18] sm:$0xff]  ;;  %s214_s11 = sld [smem:[#allocation2 + $0x4]] }
  0x10   :  { %235 = vset.pattern.permute.xlu0 %v272_v3  ;;  %236 = vset.pattern.permute.xlu1 %v272_v3  ;;  %v222_v5 = vld [vmem:[%s450_s2 + $0x8] sm:$0xff]  ;;  %v226_v7 = vld [vmem:[%s449_s1 + $0x10] sm:$0xff]  ;;  %v39_v9 = vld [vmem:[%s452_s4 + $0x1] sm:$0x1]  ;;  %s273_s1 = smov 127   ;;  %s213_s29 = sld [smem:[#allocation2 + $0x3]] }
  0x11   :  { %117 = vperm.xlu0 %235, %v98_v0   ;;  %125 = vperm.xlu1 %236, %v225_v1   ;;  %v90_v6 = vmul.f32 %v222_v5, %v317_v4  ;;  %v45_v8 = vshrl.u32 %v44_v2, 7  ;;  %v38_v10 = vld [vmem:[%s452_s4] sm:$0x1]  ;;  %s343_s4 = sld [smem:[#allocation2]]  ;;  %v223_v22 = vld [vmem:[%s450_s2 + $0x18] sm:$0xff]  ;;  %v219_v31 = vld [vmem:[%s451_s3 + $0x28] sm:$0xff] }
  0x12   :  { %237 = vrcp.f32 %v38_v10  ;;  %v86_v17 = vld [vmem:[%s450_s2] sm:$0xff]  ;;  %v359_v26 = vmax.f32 %v223_v22, 0.0  ;;  %v216_v43 = vld [vmem:[%s451_s3 + $0x10] sm:$0xff]  ;;  %v215_v50 = vld [vmem:[%s451_s3 + $0x8] sm:$0xff]  ;;  %s211_s30 = sld [smem:[#allocation2 + $0x1]]  ;;  %v110_v61 = vand.u32 127, %v44_v2 }
  0x13   :  { %v333_v11 = vmax.f32 %v90_v6, 0.0  ;;  %v335_v12 = vsub.s32 0, %v45_v8  ;;  %239 = vrcp.f32 %v39_v9  ;;  %v351_v21 = vmax.f32 %v86_v17, 0.0  ;;  %v364_v27 = vld [vmem:[%s450_s2 + $0x20] sm:$0xff]  ;;  %s274_s2 = smov 1   ;;  %s212_s8 = sld [smem:[#allocation2 + $0x2]] }
  0x14   :  { %v218_v30 = vld [vmem:[%s451_s3 + $0x20] sm:$0xff]  ;;  %v97_v32 = vmax.f32 %v364_v27, 0.0  ;;  %v141_v44 = vadd.f32 1e-06, %v216_v43  ;;  %v150_v52 = vadd.f32 1e-06, %v215_v50 }
  0x15   :  { %133 = vperm.xlu0 %235, %v226_v7   ;;  %v338_v13 = vrot.slane %v39_v9, %v335_v12  ;;  %v60_v19 = vstv %s214_s11  ;;  %v185_v34 = vadd.f32 %v218_v30, %v359_v26  ;;  %vm112_vm0 = vcmp.eq.s32.totalorder %v110_v61, 17  ;;  %v71_v8 = vld [vmem:[%s451_s3] sm:$0xff] }
  0x16   :  { %v186_v36 = vadd.f32 %v219_v31, %v97_v32  ;;  %v54_v60 = vstv %s213_s29  ;;  %vm111_vm1 = vcmp.eq.s32.totalorder %v110_v61, 0 }
  0x17   :  { %v103_v14 = vmul.f32 %v333_v11, %v338_v13  ;;  %v48_v25 = vstv %s343_s4  ;;  %v198_v38 = vmax.f32 %v185_v34, 0.0 }
  0x18   :  { %v202_v40 = vmax.f32 %v186_v36, 0.0  ;;  %v137_v0 = vstv %s211_s30 }
  0x19   :  { %129 = vrot.lane.b32.xlu0 %v333_v11, %s273_s1  ;;  %v104_v15 = vadd.f32 1e-06, %v103_v14  ;;  %v199_v41 = vmin.f32 %v198_v38, 1000.0  ;;  %v138_v5 = vadd.f32 %v137_v0, %v333_v11 }
  0x1a   :  { %v203_v42 = vmin.f32 %v202_v40, 1000.0 }
  0x1b   :  { %241 = vrcp.f32 %v104_v15  ;;  %229 = vst [vmem:[%s453_s5 + $0x18] sm:$0xff] %v199_v41 }
  0x1c   :  { %230 = vst [vmem:[%s453_s5 + $0x20] sm:$0xff] %v203_v42  ;;  %243 = vrcp.f32 %v141_v44 }
  0x1f   :  { %v345_v16 = vpop.eup %237 }
  0x20   :  { %v240_v18 = vpop.eup %239  ;;  %v55_v63 = vmul.f32 %v345_v16, %v54_v60  ;;  %v49_v14 = vmul.f32 %v345_v16, %v48_v25 }
  0x21   :  { %v43_v20 = vmul.f32 %v240_v18, %v345_v16  ;;  %v158_v18 = vstv %s212_s8 }
  0x22   :  { %v59_v3 = vrot.slane %v55_v63, %v335_v12 }
  0x23   :  { %v356_v23 = vmul.f32 %v60_v19, %v43_v20  ;;  %v378_v33 = vmul.f32 %v48_v25, %v43_v20  ;;  %v179_v19 = vadd.f32 1e-06, %v317_v4  ;;  %v53_v20 = vrot.slane %v49_v14, %v335_v12 }
  0x25   :  { %v65_v28 = vrot.slane %v356_v23, %v335_v12  ;;  %v70_v37 = vrot.slane %v378_v33, %v335_v12 }
  0x28   :  { %v242_v24 = vpop.eup %241 }
  0x29   :  { %v106_v29 = vmul.f32 %v242_v24, %v351_v21  ;;  %v244_v45 = vpop.eup %243 }
  0x2a   :  { %v143_v46 = vmul.f32 %v244_v45, %v333_v11 }
  0x2b   :  { %v107_v35 = vmax.f32 %v106_v29, 5.0 }
  0x2c   :  { %v144_v47 = vadd.f32 1e-06, %v143_v46 }
  0x2d   :  { %v385_v39 = vmin.f32 %v107_v35, 200.0 }
  0x2e   :  { %245 = vlog2.f32 %v144_v47 }
  0x2f   :  { %113 = vrot.lane.b32.xlu1 %v385_v39, %s274_s2  ;;  %247 = vrcp.f32 %v150_v52  ;;  %v169_v24 = vmul.f32 %v385_v39, %v359_v26  ;;  %v161_v30 = vmul.f32 %v385_v39, %v53_v20  ;;  %v220_v52 = vld [vmem:[%s451_s3 + $0x30] sm:$0xff] }
  0x31   :  { %v170_v4 = vmul.f32 %v169_v24, %v65_v28 }
  0x33   :  { %121 = vrot.lane.b32.xlu1 %v351_v21, %s274_s2 }
  0x3b   :  { %v246_v48 = vpop.eup %245 }
  0x3c   :  { %v146_v49 = vmul.f32 0.6931472, %v246_v48  ;;  %v248_v54 = vpop.eup %247 }
  0x3d   :  { %v152_v55 = vmul.f32 -1.0, %v248_v54 }
  0x3e   :  { %v147_v51 = vmul.f32 %v215_v50, %v146_v49 }
  0x40   :  { %v148_v53 = vmul.f32 1.442695, %v147_v51 }
  0x42   :  { %249 = vpow2.f32 %v148_v53 }
  0x4f   :  { %v250_v56 = vpop.eup %249 }
  0x50   :  { %v153_v57 = vmul.f32 %v250_v56, %v152_v55 }
  0x52   :  { %v154_v58 = vmul.f32 1.442695, %v153_v57 }
  0x54   :  { %251 = vpow2.f32 %v154_v58 }
  0x55   :  { %253 = vrcp.f32 %v138_v5 }
  0x56   :  { %255 = vrcp.f32 %v179_v19 }
  0x61   :  { %v252_v6 = vpop.eup %251 }
  0x62   :  { %v156_v10 = vmul.f32 %v252_v6, %v71_v8  ;;  %v254_v34 = vpop.eup %253 }
  0x63   :  { %v171_v42 = vmul.f32 %v254_v34, %v170_v4  ;;  %v256_v48 = vpop.eup %255 }
  0x64   :  { %v157_v17 = vsub.f32 %v156_v10, %v385_v39 }
  0x66   :  { %v159_v22 = vmul.f32 %v158_v18, %v157_v17 }
  0x68   :  { %v160_v16 = vadd.f32 %v159_v22, %v385_v39 }
  0x8c   :  { %v118_v59 = vpop.permute.xlu0 %117  ;;  %v126_v15 = vpop.permute.xlu1 %125 }
  0x90   :  { %v134_v62 = vpop.permute.xlu0 %133 }
  0x94   :  { %v130_v1 = vpop.permute.xlu0 %129 }
  0x95   :  { %v136_v7 = vsel %vm112_vm0, %v134_v62, %v130_v1 }
  0x96   :  { %v165_v2 = vsub.f32 %v136_v7, %v333_v11 }
  0x98   :  { %v166_v9 = vmul.f32 %v165_v2, %v59_v3 }
  0x9a   :  { %v167_v40 = vmul.f32 %v254_v34, %v166_v9 }
  0xa1   :  { %v114_v29 = vpop.permute.xlu1 %113 }
  0xa2   :  { %v120_v31 = vsel %vm111_vm1, %v118_v59, %v114_v29 }
  0xa3   :  { %v162_v25 = vsub.f32 %v120_v31, %v385_v39  ;;  %v221_v39 = vld [vmem:[%s451_s3 + $0x38] sm:$0xff] }
  0xa5   :  { %v163_v35 = vmul.f32 %v162_v25, %v161_v30  ;;  %v122_v36 = vpop.permute.xlu1 %121 }
  0xa6   :  { %v128_v38 = vsel %vm111_vm1, %v126_v15, %v122_v36 }
  0xa7   :  { %v164_v41 = vadd.f32 %v163_v35, %v160_v16  ;;  %v174_v43 = vsub.f32 %v128_v38, %v351_v21 }
  0xa9   :  { %v168_v44 = vsub.f32 %v164_v41, %v167_v40  ;;  %v175_v45 = vadd.f32 %v174_v43, %v359_v26 }
  0xab   :  { %v172_v46 = vsub.f32 %v168_v44, %v171_v42  ;;  %v176_v23 = vsub.f32 %v175_v45, %v97_v32 }
  0xad   :  { %v173_v28 = vadd.f32 %v221_v39, %v172_v46  ;;  %v177_v47 = vmul.f32 %v176_v23, %v70_v37 }
  0xaf   :  { %v178_v49 = vadd.f32 %v177_v47, %v333_v11  ;;  %v194_v21 = vmax.f32 %v173_v28, 5.0 }
  0xb1   :  { %v181_v50 = vmul.f32 %v256_v48, %v178_v49  ;;  %v182_v51 = vmul.f32 %v178_v49, %v173_v28  ;;  %v195_v26 = vmin.f32 %v194_v21, 120.0 }
  0xb3   :  { %v183_v53 = vmul.f32 %v182_v51, %v338_v13  ;;  %v190_v27 = vmax.f32 %v181_v50, 1.0  ;;  %228 = vst [vmem:[%s453_s5 + $0x10] sm:$0xff] %v195_v26 }
  0xb5   :  { %v184_v12 = vadd.f32 %v220_v52, %v183_v53  ;;  %v191_v32 = vmin.f32 %v190_v27, 30.0 }
  0xb7   :  { %v187_v33 = vmax.f32 %v184_v12, 1.0  ;;  %227 = vst [vmem:[%s453_s5 + $0x8] sm:$0xff] %v191_v32 }
  0xb9   :  { %v188_v11 = vmin.f32 %v187_v33, 10000.0 }
  0xbb   :  { %189 = vst [vmem:[%s453_s5] sm:$0xff] %v188_v11 }
  0xbc   :  { %210 = vsyncpa [#allocation3], 1 }

</bundles_post_ra>
